<compile_context>
chip_gen: v5e
topology: v5e:2x2
jax: 0.10.0
libtpu: 0.0.40
codegen_flags: <defaults>
</compile_context>

<pallas_src>
import functools

import jax
import jax.numpy as jnp
from jax import lax
from jax.experimental import pallas as pl
from jax.experimental.pallas import tpu as pltpu


_MASK_VALUE = -1e30   # large finite negative (avoids -inf/NaN hazards per review)


def _pick_tile(n, target):
    """Largest tile <= target that divides n and is a multiple of 8 (else n)."""
    if n <= target:
        return n
    for t in range(target, 7, -1):
        if n % t == 0 and t % 8 == 0:
            return t
    return n


# ---------------------------------------------------------------------------
# Kernels 1 & 3: tiled linear layer  y = x @ W (+ b),  W already transposed.
# ---------------------------------------------------------------------------
def _linear_kernel(x_ref, w_ref, b_ref, o_ref):
    acc = jnp.dot(x_ref[...], w_ref[...], preferred_element_type=jnp.float32)
    o_ref[...] = (acc + b_ref[...]).astype(o_ref.dtype)


def _linear(x, w, b, *, out_dtype, tm):
    """x: (B, T, K); w: (K, N) pre-transposed; b: (1, N) f32 -> (B, T, N)."""
    B, T, K = x.shape
    N = w.shape[1]
    return pl.pallas_call(
        _linear_kernel,
        out_shape=jax.ShapeDtypeStruct((B, T, N), out_dtype),
        grid_spec=pltpu.PrefetchScalarGridSpec(
            num_scalar_prefetch=0,
            grid=(B, T // tm),
            in_specs=[
                pl.BlockSpec((None, tm, K), lambda b, i: (b, i, 0)),
                # Grid-invariant weight/bias blocks: resident across the grid.
                pl.BlockSpec((K, N), lambda b, i: (0, 0)),
                pl.BlockSpec((1, N), lambda b, i: (0, 0)),
            ],
            out_specs=pl.BlockSpec((None, tm, N), lambda b, i: (b, i, 0)),
        ),
        compiler_params=pltpu.CompilerParams(
            dimension_semantics=("parallel", "parallel")),
    )(x, w, b)


# ---------------------------------------------------------------------------
# Kernel 2: flash attention (causal, online softmax), grid (B, H, nq, nk).
# ---------------------------------------------------------------------------
def _flash_kernel(q_ref, k_ref, v_ref, o_ref, m_sc, l_sc, acc_sc, *,
                  recip_approx):
    qi = pl.program_id(2)
    ki = pl.program_id(3)
    tq = q_ref.shape[0]
    tk = k_ref.shape[0]

    @pl.when(ki == 0)
    def _():
        m_sc[...] = jnp.full_like(m_sc, -jnp.inf)
        l_sc[...] = jnp.zeros_like(l_sc)
        acc_sc[...] = jnp.zeros_like(acc_sc)

    # Skip kv tiles that lie entirely above the causal diagonal.
    @pl.when(ki * tk <= qi * tq + (tq - 1))
    def _():
        # Scores: contract last dims of q and k (no in-kernel transpose).
        # The C**-0.5 scale is already folded into Wq.
        s = lax.dot_general(q_ref[...], k_ref[...],
                            (((1,), (1,)), ((), ())),
                            preferred_element_type=jnp.float32)    # (tq, tk)
        row = qi * tq + lax.broadcasted_iota(jnp.int32, (tq, tk), 0)
        col = ki * tk + lax.broadcasted_iota(jnp.int32, (tq, tk), 1)
        s = jnp.where(col <= row, s, _MASK_VALUE)

        m_prev = m_sc[...]                                          # (tq, 1)
        m_new = jnp.maximum(m_prev, jnp.max(s, axis=-1, keepdims=True))
        alpha = jnp.exp(m_prev - m_new)
        p = jnp.exp(s - m_new)                                      # f32
        l_sc[...] = alpha * l_sc[...] + jnp.sum(p, axis=-1, keepdims=True)
        acc_sc[...] = alpha * acc_sc[...] + jnp.dot(
            p.astype(v_ref.dtype), v_ref[...],
            preferred_element_type=jnp.float32)
        m_sc[...] = m_new

    @pl.when(ki == pl.num_programs(3) - 1)
    def _():
        inv_l = pl.reciprocal(l_sc[...], approx=recip_approx)
        # (dropout on attention probs / output is identity in eval mode)
        o_ref[...] = (acc_sc[...] * inv_l).astype(o_ref.dtype)


def _flash_attention(q, k, v, *, tq, tk, recip_approx):
    """q/k/v: (B, H, T, hs) -> (B, H, T, hs)."""
    B, H, T, hs = q.shape
    kernel = functools.partial(_flash_kernel, recip_approx=recip_approx)
    return pl.pallas_call(
        kernel,
        out_shape=jax.ShapeDtypeStruct((B, H, T, hs), q.dtype),
        grid_spec=pltpu.PrefetchScalarGridSpec(
            num_scalar_prefetch=0,
            grid=(B, H, T // tq, T // tk),
            in_specs=[
                pl.BlockSpec((None, None, tq, hs), lambda b, h, i, j: (b, h, i, 0)),
                pl.BlockSpec((None, None, tk, hs), lambda b, h, i, j: (b, h, j, 0)),
                pl.BlockSpec((None, None, tk, hs), lambda b, h, i, j: (b, h, j, 0)),
            ],
            out_specs=pl.BlockSpec((None, None, tq, hs),
                                   lambda b, h, i, j: (b, h, i, 0)),
            scratch_shapes=[
                pltpu.VMEM((tq, 1), jnp.float32),    # running max m
                pltpu.VMEM((tq, 1), jnp.float32),    # running denom l
                pltpu.VMEM((tq, hs), jnp.float32),   # output accumulator
            ],
        ),
        compiler_params=pltpu.CompilerParams(
            dimension_semantics=("parallel", "parallel", "parallel", "arbitrary")),
    )(q, k, v)


# ---------------------------------------------------------------------------
# Full module forward.
# ---------------------------------------------------------------------------
def multi_head_attention(x, wq, wk, wv, wp, bp, *, n_head, head_size,
                         compute_dtype=jnp.bfloat16):
    """x: (B, T, C); wq/wk/wv: (n_head, head_size, C); wp: (C, C); bp: (C,)."""
    B, T, C = x.shape
    assert n_head * head_size == C
    scale = float(C) ** -0.5          # module scales scores by C**-0.5

    # --- wrapper-side layout plumbing (keeps all transposes out of kernels) --
    wqT = wq.reshape(C, C).T * scale              # scale folded into Wq (free)
    wkT = wk.reshape(C, C).T
    wvT = wv.reshape(C, C).T
    w_qkv = jnp.concatenate([wqT, wkT, wvT], axis=1).astype(compute_dtype)  # (C, 3C)
    w_proj = wp.T.astype(compute_dtype)                                     # (C, C)
    b_proj = bp.reshape(1, C).astype(jnp.float32)
    b_zero = jnp.zeros((1, 3 * C), jnp.float32)

    xc = x.astype(compute_dtype)

    tm = _pick_tile(T, 256)           # rows per linear-kernel block
    tq = _pick_tile(T, 128)           # q rows per attention tile
    tk = _pick_tile(T, 128)           # kv rows per attention tile
    recip_approx = bool(jnp.dtype(compute_dtype) != jnp.dtype(jnp.float32))

    # 1) fused QKV projection: one lane-dense (T, C) @ (C, 3C) matmul.
    qkv = _linear(xc, w_qkv, b_zero, out_dtype=compute_dtype, tm=tm)   # (B, T, 3C)

    # 2) split into head-major layout (B, n_head, T, head_size).
    def to_heads(t):
        return t.reshape(B, T, n_head, head_size).transpose(0, 2, 1, 3)
    q = to_heads(qkv[..., :C])
    k = to_heads(qkv[..., C:2 * C])
    v = to_heads(qkv[..., 2 * C:])

    # 3) flash attention (causal, online softmax; eval-mode dropout = id).
    o = _flash_attention(q, k, v, tq=tq, tk=tk, recip_approx=recip_approx)

    # 4) concat heads + output projection + bias as one lane-dense matmul.
    o = o.transpose(0, 2, 1, 3).reshape(B, T, C)
    return _linear(o, w_proj, b_proj, out_dtype=x.dtype, tm=tm)


def _reference(x, wq, wk, wv, wp, bp, *, n_head, head_size):
    """Plain-JAX mirror of the PyTorch forward (eval mode)."""
    B, T, C = x.shape
    outs = []
    for h in range(n_head):
        q = x @ wq[h].T
        k = x @ wk[h].T
        v = x @ wv[h].T
        att = (q @ jnp.swapaxes(k, -1, -2)) * (C ** -0.5)
        mask = jnp.tril(jnp.ones((T, T), dtype=bool))
        att = jnp.where(mask, att, -jnp.inf)
        att = jax.nn.softmax(att, axis=-1)
        outs.append(att @ v)
    out = jnp.concatenate(outs, axis=-1)
    return out @ wp.T + bp


if __name__ == "__main__":
    # small shapes consistent with the module
    B, T = 2, 8          # batch, seq_len
    n_embd = 32
    n_head = 4
    head_size = n_embd // n_head

    key = jax.random.PRNGKey(0)
    kx, kq, kk, kv, kp, kb = jax.random.split(key, 6)

    x = jax.random.normal(kx, (B, T, n_embd), dtype=jnp.float32)
    wq = jax.random.normal(kq, (n_head, head_size, n_embd), jnp.float32) * (n_embd ** -0.5)
    wk = jax.random.normal(kk, (n_head, head_size, n_embd), jnp.float32) * (n_embd ** -0.5)
    wv = jax.random.normal(kv, (n_head, head_size, n_embd), jnp.float32) * (n_embd ** -0.5)
    wp = jax.random.normal(kp, (n_embd, n_embd), jnp.float32) * (n_embd ** -0.5)
    bp = jax.random.normal(kb, (n_embd,), jnp.float32) * 0.01

    ref = _reference(x, wq, wk, wv, wp, bp, n_head=n_head, head_size=head_size)

    # f32 compute path: tight numerical check against the plain-JAX reference.
    out_f32 = multi_head_attention(x, wq, wk, wv, wp, bp, n_head=n_head,
                                   head_size=head_size, compute_dtype=jnp.float32)
    out_f32 = jax.block_until_ready(out_f32)
    assert out_f32.shape == (B, T, n_embd)
    assert jnp.allclose(out_f32, ref, atol=2e-4, rtol=2e-4), "f32 mismatch vs reference"

    # bf16 compute path (MXU-native on v5e/v6e/v7x), f32 accumulation.
    out_bf16 = multi_head_attention(x, wq, wk, wv, wp, bp, n_head=n_head,
                                    head_size=head_size, compute_dtype=jnp.bfloat16)
    out_bf16 = jax.block_until_ready(out_bf16)
    assert out_bf16.shape == (B, T, n_embd)
    assert jnp.allclose(out_bf16, ref, atol=8e-2, rtol=8e-2), "bf16 mismatch vs reference"

    print("KERNEL_OK")
</pallas_src>

<mosaic_0001>
module attributes {stable_mosaic.version = 11 : i64} {
  func.func @_linear_kernel(%arg0: i32, %arg1: i32, %arg2: memref<1x8x32xf32, #tpu.memory_space<vmem>>, %arg3: memref<32x96xf32, #tpu.memory_space<vmem>>, %arg4: memref<1x96xf32, #tpu.memory_space<vmem>>, %arg5: memref<1x8x96xf32, #tpu.memory_space<vmem>>) attributes {dimension_semantics = [#tpu.dimension_semantics<parallel>, #tpu.dimension_semantics<parallel>], iteration_bounds = array<i64: 2, 1>, scalar_prefetch = 0 : i64, scratch_operands = 0 : i64, tpu.core_type = #tpu.core_type<tc>, window_params = [{transform_indices = @transform_0, window_bounds = array<i64: 1, 8, 32>}, {pipeline_mode = #tpu.pipeline_mode<synchronous>, transform_indices = @transform_1, window_bounds = array<i64: 32, 96>}, {pipeline_mode = #tpu.pipeline_mode<synchronous>, transform_indices = @transform_2, window_bounds = array<i64: 1, 96>}, {transform_indices = @transform_3, window_bounds = array<i64: 1, 8, 96>}]} {
    %c0 = arith.constant 0 : index
    %c0_0 = arith.constant 0 : index
    %c0_1 = arith.constant 0 : index
    %0 = vector.load %arg2[%c0, %c0_0, %c0_1] : memref<1x8x32xf32, #tpu.memory_space<vmem>>, vector<1x8x32xf32>
    %1 = vector.shape_cast %0 : vector<1x8x32xf32> to vector<8x32xf32>
    %c0_2 = arith.constant 0 : index
    %c0_3 = arith.constant 0 : index
    %2 = vector.load %arg3[%c0_2, %c0_3] : memref<32x96xf32, #tpu.memory_space<vmem>>, vector<32x96xf32>
    %cst = arith.constant dense<0.000000e+00> : vector<8x96xf32>
    %3 = tpu.matmul %1, %2, %cst {dimension_numbers = #tpu.dot_dimension_numbers<[1], [0], [0], [1], [0, 0, 1, 1], [], []>} : vector<8x32xf32>, vector<32x96xf32>, vector<8x96xf32> -> vector<8x96xf32>
    %c0_4 = arith.constant 0 : index
    %c0_5 = arith.constant 0 : index
    %4 = vector.load %arg4[%c0_4, %c0_5] : memref<1x96xf32, #tpu.memory_space<vmem>>, vector<1x96xf32>
    %5 = vector.broadcast %4 : vector<1x96xf32> to vector<8x96xf32>
    %6 = arith.addf %3, %5 : vector<8x96xf32>
    %c0_6 = arith.constant 0 : index
    %c0_7 = arith.constant 0 : index
    %c0_8 = arith.constant 0 : index
    %7 = vector.load %arg5[%c0_6, %c0_7, %c0_8] : memref<1x8x96xf32, #tpu.memory_space<vmem>>, vector<1x8x96xf32>
    %8 = vector.shape_cast %7 : vector<1x8x96xf32> to vector<8x96xf32>
    %9 = vector.shape_cast %6 : vector<8x96xf32> to vector<1x8x96xf32>
    tpu.vector_store %arg5[%c0_6, %c0_7, %c0_8], %9 {strides = array<i32>} : memref<1x8x96xf32, #tpu.memory_space<vmem>>, vector<1x8x96xf32>,
    return
  }
  func.func @transform_0(%arg0: i32, %arg1: i32) -> (i32, i32, i32) {
    %c0_i32 = arith.constant 0 : i32
    %c0_i32_0 = arith.constant 0 : i32
    return %arg0, %arg1, %c0_i32 : i32, i32, i32
  }
  func.func @transform_1(%arg0: i32, %arg1: i32) -> (i32, i32) {
    %c0_i32 = arith.constant 0 : i32
    %c0_i32_0 = arith.constant 0 : i32
    %c0_i32_1 = arith.constant 0 : i32
    return %c0_i32, %c0_i32_0 : i32, i32
  }
  func.func @transform_2(%arg0: i32, %arg1: i32) -> (i32, i32) {
    %c0_i32 = arith.constant 0 : i32
    %c0_i32_0 = arith.constant 0 : i32
    %c0_i32_1 = arith.constant 0 : i32
    return %c0_i32, %c0_i32_0 : i32, i32
  }
  func.func @transform_3(%arg0: i32, %arg1: i32) -> (i32, i32, i32) {
    %c0_i32 = arith.constant 0 : i32
    %c0_i32_0 = arith.constant 0 : i32
    return %arg0, %arg1, %c0_i32 : i32, i32, i32
  }
}

</mosaic_0001>

<bundles_post_ra>
// kernel: tpu_custom_call.1
= control target key start
LH: loop header
LB: loop body
LE: loop exit
PB: predicated region body
PF: predicated region fallthrough
CT: control target
= control target key end

     0   :  { %8 = vsyncpa [#allocation3], 0  ;;  %s773_s0 = inlined_call_operand.hbm [shape: f32[2,8,32], index: 0, kind: input, shape index: {}]   ;;  %s774_s1 = inlined_call_operand.hbm [shape: f32[32,96], index: 1, kind: input, shape index: {}]   ;;  %s775_s2 = inlined_call_operand.vmem [shape: f32[1,96], index: 2, kind: input, shape index: {}]   ;;  %s776_s3 = inlined_call_operand.hbm [shape: f32[2,8,96], index: 3, kind: output, shape index: {}]  }
   0x1   :  { %10 = vsyncpa [#allocation3 + $0x1], 0 }
   0x2   :  { %11 = vsyncpa [#allocation6], 0 }
   0x3   :  { %12 = vsyncpa [#allocation4], 0 }
   0x4   :  { %14 = vsyncpa [#allocation4 + $0x1], 0  ;;  %s627_s12 = smov 0   ;;  %s629_s13 = smov 0  }
   0x5   :  { %s631_s14 = smov 0   ;;  %s633_s15 = smov 0  }
   0x6   :  { %s635_s16 = smov 0   ;;  %s637_s17 = smov 0  }
   0x7 LB: > { %s364_s18 = sadd.s32 4294967295, %s602_s17   ;;  %p366_p0 = scmp.ge.s32.totalorder %s602_s17, 1  ;;  %s602_s17 = sphi %s637_s17, %s20_s17   ;;  %s598_s16 = sphi %s635_s16, %s787_s16   ;;  %s594_s15 = sphi %s633_s15, %s786_s15   ;;  %s590_s14 = sphi %s631_s14, %s785_s14   ;;  %s586_s13 = sphi %s629_s13, %s784_s13   ;;  %s582_s12 = sphi %s627_s12, %s783_s12  }
   0x8   : > { %p659_p1 = scmp.eq.s32.totalorder %s364_s18, 0  ;;  %p135_p2 = scmp.lt.s32.totalorder %s602_s17, 3 }
   0x9   : > { %s146_s22 = sshll.u32 %s774_s1, 4  ;;  %s604_s24 = smov [#allocation5]   ;;  %s147_s22 = int_to_ptr.hbm [resolvable:$true] %s146_s22 }
   0xa   : > { %p667_p3 = pnand %p366_p0, %p135_p2  ;;  %s148_s25 = sshll.u32 %s604_s24, 4  ;;  %s149_s25 = int_to_ptr.vmem [resolvable:$true] %s148_s25 }
   0xb   : > { %p368_p6 = scmp.ge.s32.totalorder %s602_s17, 2  ;;  %s605_s26 = smov 128  }
   0xc   : > { %p388_p4 = pneg %p667_p3  ;;  %s606_s27 = smov 8  }
   0xd   : > { %s365_s28 = sadd.s32 4294967294, %s602_s17   ;;  %s32_s29 = sadd.s32 1, %s598_s16 }
   0xe   : > { %p389_p5 = pnand %p388_p4, %p659_p1  ;;  %s41_s30 = sadd.s32 1, %s590_s14 }
   0xf   : > { %p34_p7 = scmp.ge.s32.totalorder %s32_s29, 2  ;;  %p48_p8 = scmp.ne.s32.totalorder %s590_s14, %s586_s13 }
  0x10   : > { %391 = dma.hbm_to_vmem [thread:$0]  (!%p389_p5), %s147_s22, 512, %s149_s25, [#allocation6], %s605_s26, %s605_s26, %s606_s27  }
  0x11   : > { %p49_p9 = scmp.eq.s32.totalorder %s602_s17, 0  ;;  %p54_p10 = scmp.ne.s32.totalorder %s586_s13, %s582_s12 }
  0x12   : > { %s789_s29 = smov (%p34_p7, %s32_s29), 0  ;;  %p122_p13 = scmp.eq.s32.totalorder %s364_s18, 1 }
  0x13   : > { %p686_p11 = por %p49_p9, %p48_p8  ;;  %p692_p12 = por %p659_p1, %p54_p10 }
  0x14   : > { %s36_s6 = ssub.s32 %s598_s16, %s789_s29  ;;  %p128_p2 = scmp.eq.s32.totalorder %s365_s28, 1 }
  0x15   : > { %p39_p0 = scmp.eq.s32.totalorder %s36_s6, 0  ;;  %p698_p4 = por %p122_p13, %p48_p8 }
  0x16   : > { %p401_p5 = scmp.lt.s32.totalorder %s602_s17, 2  ;;  %p706_p7 = por %p128_p2, %p54_p10 }
  0x17   : > { %s704_s8 = scalar_select %p39_p0, %s590_s14, %s41_s30  }
  0x18   : > { %s165_s10 = sand.u32 1, %s590_s14   ;;  %s370_s20 = sshll.u32 %s598_s16, 3 }
  0x19   : > { %s369_s11 = sshll.u32 %s165_s10, 3  ;;  %s174_s18 = scalar_lea.hbm %s773_s0, %s370_s20 }
  0x1a   : > { %s169_s24 = scalar_lea.vmem [#allocation2], %s369_s11  ;;  %s176_s26 = sshll.u32 %s174_s18, 4  ;;  %s177_s26 = int_to_ptr.hbm [resolvable:$true] %s176_s26 }
  0x1b   : > { %s178_s25 = sshll.u32 %s169_s24, 4  ;;  %p393_p8 = pnand %p401_p5, %p686_p11  ;;  %s179_s25 = int_to_ptr.vmem [resolvable:$true] %s178_s25 }
  0x1c   : > { %s166_s27 = scalar_lea.sflag [#allocation3], %s165_s10  ;;  %187 = sbr.rel (%p667_p3) target bundleno = 175 (0xaf), region = 32 }
  0x1d   : > { %395 = dma.hbm_to_vmem [thread:$0]  (!%p393_p8), %s177_s26, 128, %s179_s25, %s166_s27  }
  0x1e   : > { %s720_s28 = sand.u32 (!%p667_p3), 1, %s586_s13  }
  0x1f   : > { %s372_s30 = sshll.u32 (!%p667_p3), %s720_s28, 3  ;;  %s190_s6 = scalar_lea.sflag (!%p667_p3), [#allocation3], %s720_s28 }
  0x20   : > { %s193_s11 = scalar_lea.vmem (!%p667_p3), [#allocation2], %s372_s30 }
  0x21   : > { %569 = dma.done.wait (%p692_p12), %s190_s6, 128  }
  0x22   : > { %571 = vsyncadd (%p692_p12), %s190_s6, 4294967168 }
  0x23   : > { %573 = dma.done.wait (%p659_p1), [#allocation6], 512  }
  0x24   : > { %575 = vsyncadd (%p659_p1), [#allocation6], 4294966784  ;;  %v226_v0 = vld [vmem:[#allocation5 + $0x18] sm:$0xff]  ;;  %v225_v1 = vld [vmem:[#allocation5 + $0x10] sm:$0xff]  ;;  %vm231_vm0 = vcmask 261120   ;;  %s377_s23 = sshll.u32 %s594_s15, 3 }
  0x25   : > { %247 = vmatpush.msra.mxu0 %v226_v0  ;;  %v224_v2 = vld [vmem:[#allocation5 + $0x8] sm:$0xff]  ;;  %v223_v3 = vld [vmem:[#allocation5] sm:$0xff]  ;;  %v222_v4 = vld [vmem:[%s193_s11] sm:$0xff]  ;;  %s269_s10 = scalar_lea.hbm %s776_s3, %s377_s23  ;;  %s221_s21 = scalar_lea.vmem [#allocation7], %s372_s30  ;;  %vm255_vm1 = vcmask 785408  }
  0x26   : > { %v455_v5 = vld [vmem:[%s775_s2] ss:$0 sm:$0xff]  ;;  %s271_s22 = sshll.u32 %s221_s21, 4  ;;  %s273_s18 = sshll.u32 %s269_s10, 4  ;;  %s272_s22 = int_to_ptr.vmem [resolvable:$true] %s271_s22  ;;  %s274_s18 = int_to_ptr.hbm [resolvable:$true] %s273_s18 }
  0x27   : > { %248 = vmatpush.msra.mxu0 %v225_v1  ;;  %s258_s24 = scalar_lea.sflag [#allocation4], %s720_s28  ;;  %s530_s15 = sshra.s32 %s274_s18, 4  ;;  %s531_s15 = int_to_ptr.hbm [resolvable:$true] %s530_s15 }
  0x28   : > { %s532_s25 = scalar_lea.hbm %s531_s15, 8  ;;  %s536_s30 = scalar_lea.hbm %s776_s3, 16 }
  0x29   : > { %249 = vmatpush.msra.mxu0 %v224_v2  ;;  %p533_p1 = scmp.ne.s32.totalorder %s531_s15, %s532_s25  ;;  %p537_p10 = scmp.lt.s32.totalorder %s531_s15, %s776_s3 }
  0x2a   : > { %p538_p11 = scmp.lt.s32.totalorder %s536_s30, %s532_s25 }
  0x2b   : > { %250 = vmatpush.msra.mxu0 %v223_v3  ;;  %p534_p3 = pnand %p533_p1, %p698_p4 }
  0x2c   : > { %375 = vmatmul.msk.f32.vlgmr.msra.gmra.mxu0 %vm231_vm0, %v222_v4  ;;  %p539_p12 = por %p538_p11, %p537_p10 }
  0x2d   : > { %p535_p9 = pneg %p534_p3 }
  0x2f   : > { %p540_p13 = pnand %p539_p12, %p535_p9 }
  0xa9   : > { %v252_v6 = vpop.f32.mrf.mxu0 }
  0xaa   : > { %v253_v7 = vadd.f32 %v455_v5, %v252_v6 }
  0xac   : > { %256 = vst.msk [vmem:[%s221_s21] sm:$0xff] %vm255_vm1, %v253_v7 }
  0xad   : > { %543 = shalt.err (!%p540_p13)
}
  0xae   : > { %386 = dma.vmem_to_hbm [thread:$0]  (%p698_p4), %s272_s22, 128, %s274_s18, %s258_s24  }
  0xaf PF: > { %s285_s28 = sand.u32 1, %s582_s12   ;;  %p397_p0 = pnand %p368_p6, %p706_p7 }
  0xb0   : > { %s286_s23 = scalar_lea.sflag [#allocation4], %s285_s28 }
  0xb1   : > { %p398_p2 = pneg %p397_p0 }
  0xb3   : > { %577 = dma.done.wait (%p398_p2), %s286_s23, 128  }
  0xb4   : > { %579 = vsyncadd (%p398_p2), %s286_s23, 4294967168  ;;  %s20_s17 = sadd.s32 1, %s602_s17   ;;  %s783_s12 = smov %s586_s13 }
  0xb5   : > { %p17_p5 = scmp.ge.s32.totalorder %s20_s17, 4   ;;  %s784_s13 = smov %s590_s14 }
  0xb6   : > { %s785_s14 = smov %s704_s8  ;;  %s786_s15 = smov %s598_s16 }
  0xb7   : > { %s787_s16 = smov %s789_s29  ;;  %19 = sbr.rel (!%p17_p5) target bundleno = 7 (0x7), region = 81 }
  0xbc   :  { %292 = vsyncpa [#allocation3], 1 }
  0xbd   :  { %294 = vsyncpa [#allocation3 + $0x1], 1 }
  0xbe   :  { %295 = vsyncpa [#allocation6], 1 }
  0xbf   :  { %296 = vsyncpa [#allocation4], 1 }
  0xc0   :  { %298 = vsyncpa [#allocation4 + $0x1], 1 }

</bundles_post_ra>
